<compile_context>
chip_gen: v7x
topology: tpu7x:2x2x1
jax: 0.10.0
libtpu: 0.0.40
codegen_flags: <defaults>
</compile_context>

<pallas_src>
import functools

import jax
import jax.numpy as jnp
import numpy as np
from jax import lax
from jax.experimental import pallas as pl
from jax.experimental.pallas import tpu as pltpu

COMPUTE_DTYPE = jnp.bfloat16          # MXU operand dtype (f32 accumulation everywhere)


@functools.lru_cache(maxsize=None)
def _vmem_limit():
    """Per-generation scoped-VMEM budget (bytes)."""
    try:
        kind = jax.devices()[0].device_kind.lower()
    except Exception:
        return 32 * 1024 * 1024
    if "v5" in kind or "v6" in kind:
        return 96 * 1024 * 1024        # 128 MiB physical VMEM -> generous budget
    if "v7" in kind or "7x" in kind:
        return 48 * 1024 * 1024        # 64 MiB physical VMEM -> leave headroom
    return 32 * 1024 * 1024            # unknown / older chips: conservative default


def _round_up(x, m):
    return ((x + m - 1) // m) * m


def _pick_tile(dim, target, align):
    """Largest multiple of `align` <= target that divides `dim`, else the full dim."""
    if dim <= target:
        return dim
    t = (target // align) * align
    while t >= align:
        if dim % t == 0:
            return t
        t -= align
    return dim


# ---------------------------------------------------------------------------
# Tiled linear: y = x @ w + b
# ---------------------------------------------------------------------------
def _linear_kernel(x_ref, w_ref, b_ref, o_ref, acc_ref):
    @pl.when(pl.program_id(2) == 0)
    def _():
        acc_ref[...] = jnp.zeros_like(acc_ref)

    acc_ref[...] += jnp.dot(x_ref[...], w_ref[...],
                            preferred_element_type=jnp.float32)

    @pl.when(pl.program_id(2) == pl.num_programs(2) - 1)
    def _():
        o_ref[...] = (acc_ref[...] + b_ref[...]).astype(o_ref.dtype)


def pallas_linear(x, w, b, *, out_dtype=jnp.float32):
    """y = x @ w + b.  x: (N, Cin), w: (Cin, Cout), b: (Cout,)."""
    N, Cin = x.shape
    Cout = w.shape[1]

    # Row tile: up to 512 (multiple of 256 for v6e/v7x MXU), 16-aligned for bf16
    # sublane packing.  Pad N so the tile always divides -> never falls back to a
    # full-dim block that could blow the VMEM limit.
    tm = min(512, _round_up(N, 16))
    Np = _round_up(N, tm)
    if Np != N:
        x = jnp.pad(x, ((0, Np - N), (0, 0)))

    tk = _pick_tile(Cin, 1024, 128)
    tn = _pick_tile(Cout, 1024, 128)
    grid = (Np // tm, Cout // tn, Cin // tk)

    out = pl.pallas_call(
        _linear_kernel,
        out_shape=jax.ShapeDtypeStruct((Np, Cout), out_dtype),
        grid=grid,
        in_specs=[
            pl.BlockSpec((tm, tk), lambda i, j, k: (i, k)),
            pl.BlockSpec((tk, tn), lambda i, j, k: (k, j)),
            pl.BlockSpec((1, tn), lambda i, j, k: (0, j)),
        ],
        out_specs=pl.BlockSpec((tm, tn), lambda i, j, k: (i, j)),
        scratch_shapes=[pltpu.VMEM((tm, tn), jnp.float32)],
        compiler_params=pltpu.CompilerParams(
            dimension_semantics=("parallel", "parallel", "arbitrary"),
            vmem_limit_bytes=_vmem_limit(),
        ),
    )(x, w, b.reshape(1, Cout).astype(jnp.float32))
    return out if Np == N else out[:N]


# ---------------------------------------------------------------------------
# Attention: grid over (batch, query tile); all heads handled inside one step.
# ---------------------------------------------------------------------------
def _make_attn_kernel(num_heads, head_dim):
    def kernel(q_ref, k_ref, v_ref, o_ref):
        q = q_ref[0]          # (tq, C) bf16
        k = k_ref[0]          # (S,  C) bf16
        v = v_ref[0]          # (S,  C) bf16
        for h in range(num_heads):             # static unroll (small H for ViT)
            lo = h * head_dim
            hi = lo + head_dim
            qh = q[:, lo:hi]
            kh = k[:, lo:hi]
            vh = v[:, lo:hi]
            # scores (tq, S): contract last dims directly (no explicit k.T), f32 acc
            s = lax.dot_general(qh, kh, (((1,), (1,)), ((), ())),
                                preferred_element_type=jnp.float32)
            m = jnp.max(s, axis=-1, keepdims=True)
            p = jnp.exp(s - m)                                       # f32 (v5e-safe)
            inv = pl.reciprocal(jnp.sum(p, axis=-1, keepdims=True), approx=True)
            # Deferred normalization: scale the small (tq, hd) PV result instead of
            # the (tq, S) probability matrix.
            oh = jnp.dot(p.astype(vh.dtype), vh,
                         preferred_element_type=jnp.float32) * inv
            # Write this head's columns immediately (no concat, frees vregs early);
            # the full (1, tq, C) block is written back to HBM lane-dense by the
            # pipeline after the body.
            o_ref[0, :, lo:hi] = oh.astype(o_ref.dtype)
    return kernel


def pallas_attention(q, k, v, *, num_heads, embed_dim,
                     q_col=0, k_col=0, v_col=0, out_dtype=COMPUTE_DTYPE):
    """q: (B, T, Cq_tot), k/v: (B, S, C*_tot); reads column block `*_col` of width
    embed_dim from each (lets q/k/v alias one fused (B, T, 3C) projection slab)."""
    B, T, _ = q.shape
    S = k.shape[1]
    head_dim = embed_dim // num_heads
    tq = _pick_tile(T, 256, 8)                 # query tile (full T if it does not divide)
    kernel = _make_attn_kernel(num_heads, head_dim)
    return pl.pallas_call(
        kernel,
        out_shape=jax.ShapeDtypeStruct((B, T, embed_dim), out_dtype),
        grid=(B, T // tq),
        in_specs=[
            pl.BlockSpec((1, tq, embed_dim), lambda b, t, c=q_col: (b, t, c)),
            pl.BlockSpec((1, S, embed_dim), lambda b, t, c=k_col: (b, 0, c)),
            pl.BlockSpec((1, S, embed_dim), lambda b, t, c=v_col: (b, 0, c)),
        ],
        out_specs=pl.BlockSpec((1, tq, embed_dim), lambda b, t: (b, t, 0)),
        compiler_params=pltpu.CompilerParams(
            dimension_semantics=("parallel", "parallel"),
            vmem_limit_bytes=_vmem_limit(),
        ),
    )(q, k, v)


# ---------------------------------------------------------------------------
# One-time parameter preparation (hoisted out of the forward hot path).
# ---------------------------------------------------------------------------
def prepare_params(params, *, proj_value=True, fuse_qkv=True):
    cd = COMPUTE_DTYPE
    prepped = {
        "wq": params["wq"].astype(cd), "bq": params["bq"].astype(jnp.float32),
        "wk": params["wk"].astype(cd), "bk": params["bk"].astype(jnp.float32),
        "wo": params["wo"].astype(cd), "bo": params["bo"].astype(jnp.float32),
    }
    if proj_value:
        prepped["wv"] = params["wv"].astype(cd)
        prepped["bv"] = params["bv"].astype(jnp.float32)
    if fuse_qkv:
        ws = [prepped["wq"], prepped["wk"]] + ([prepped["wv"]] if proj_value else [])
        bs = [prepped["bq"], prepped["bk"]] + ([prepped["bv"]] if proj_value else [])
        prepped["w_qkv"] = jnp.concatenate(ws, axis=1)     # (C, 2C or 3C)
        prepped["b_qkv"] = jnp.concatenate(bs, axis=0)
    return prepped


# ---------------------------------------------------------------------------
# MHA forward (glue in plain JAX, hot paths in Pallas)
# ---------------------------------------------------------------------------
def mha_forward(query, key, value, params, *, num_heads, proj_value=True,
                self_attn=None):
    T, B, C = query.shape
    S = key.shape[0]
    cd = COMPUTE_DTYPE

    to_bm = lambda x: x.astype(cd).transpose(1, 0, 2)      # (L,B,C) -> (B,L,C), bf16

    if self_attn is None:                                   # only reliable un-jitted
        self_attn = (query is key) and (key is value)

    if self_attn and "w_qkv" in params:
        # Fused QKV projection: the activation slab is read from HBM once.
        x_bm = to_bm(query)                                 # (B, T, C)
        w_cat, b_cat = params["w_qkv"], params["b_qkv"]
        qkv = pallas_linear(x_bm.reshape(B * T, C), w_cat, b_cat, out_dtype=cd)
        qkv = qkv.reshape(B, T, w_cat.shape[1])
        if C % 128 == 0:
            # read q/k/v straight out of the fused slab via column block offsets
            q_arr = k_arr = qkv
            v_arr = qkv if proj_value else x_bm
            cols = (0, 1, 2 if proj_value else 0)
        else:
            q_arr = qkv[:, :, 0:C]
            k_arr = qkv[:, :, C:2 * C]
            v_arr = qkv[:, :, 2 * C:3 * C] if proj_value else x_bm
            cols = (0, 0, 0)
    else:
        q_arr = pallas_linear(to_bm(query).reshape(B * T, C), params["wq"],
                              params["bq"], out_dtype=cd).reshape(B, T, C)
        k_arr = pallas_linear(to_bm(key).reshape(B * S, C), params["wk"],
                              params["bk"], out_dtype=cd).reshape(B, S, C)
        if proj_value:
            v_arr = pallas_linear(to_bm(value).reshape(B * S, C), params["wv"],
                                  params["bv"], out_dtype=cd).reshape(B, S, C)
        else:
            v_arr = to_bm(value)
        cols = (0, 0, 0)

    attn = pallas_attention(q_arr, k_arr, v_arr, num_heads=num_heads, embed_dim=C,
                            q_col=cols[0], k_col=cols[1], v_col=cols[2],
                            out_dtype=cd)                   # (B, T, C), lane-dense

    out = pallas_linear(attn.reshape(B * T, C), params["wo"], params["bo"],
                        out_dtype=jnp.float32)
    return out.reshape(B, T, C).transpose(1, 0, 2)          # back to (T, B, C)


# Pure-JAX f32 reference (matches the PyTorch forward: no scaling, no dropout).
def mha_reference(query, key, value, params, num_heads, proj_value=True):
    T, B, C = query.shape
    S = key.shape[0]
    hd = C // num_heads
    lin = lambda x, w, b: x @ w + b
    q = lin(query, params["wq"], params["bq"])
    k = lin(key, params["wk"], params["bk"])
    v = lin(value, params["wv"], params["bv"]) if proj_value else value
    split = lambda x, L: x.reshape(L, B * num_heads, hd).transpose(1, 0, 2)
    qh, kh, vh = split(q, T), split(k, S), split(v, S)
    s = jnp.einsum("btd,bsd->bts", qh, kh)
    w = jax.nn.softmax(s, axis=-1)
    o = jnp.einsum("bts,bsd->btd", w, vh)
    o = o.transpose(1, 0, 2).reshape(T, B, C)
    return lin(o, params["wo"], params["bo"])


# ---------------------------------------------------------------------------
def make_params(rng, embed_dim):
    # Deterministic synthetic params; weights stored as (Cin, Cout) i.e. torch W^T.
    keys = jax.random.split(rng, 8)
    bound = 1.0 / np.sqrt(embed_dim)
    u = lambda k, shape: jax.random.uniform(
        k, shape, jnp.float32, minval=-bound, maxval=bound)
    return {
        "wq": u(keys[0], (embed_dim, embed_dim)), "bq": u(keys[1], (embed_dim,)),
        "wk": u(keys[2], (embed_dim, embed_dim)), "bk": u(keys[3], (embed_dim,)),
        "wv": u(keys[4], (embed_dim, embed_dim)), "bv": u(keys[5], (embed_dim,)),
        "wo": u(keys[6], (embed_dim, embed_dim)), "bo": u(keys[7], (embed_dim,)),
    }


if __name__ == "__main__":
    root = jax.random.PRNGKey(0)
    k_x, k_p, k_q2, k_k2, k_v2, k_p2 = jax.random.split(root, 6)

    # Test 1: ViT-style self-attention (fused QKV + column-offset attention reads).
    T, B, C, H = 16, 2, 128, 4
    x = jax.random.normal(k_x, (T, B, C), jnp.float32)
    params = make_params(k_p, C)
    prepped = prepare_params(params, proj_value=True)              # hoisted weight prep
    fwd = jax.jit(functools.partial(mha_forward, num_heads=H,
                                    proj_value=True, self_attn=True))
    out = jax.block_until_ready(fwd(x, x, x, prepped))
    ref = mha_reference(x, x, x, params, num_heads=H)
    assert out.shape == (T, B, C)
    # bf16 MXU operands (f32 accumulation) -> relaxed tolerance vs the f32 reference.
    np.testing.assert_allclose(np.asarray(out), np.asarray(ref), rtol=5e-2, atol=5e-2)

    # Test 2: cross-attention with proj_value=False (general / non-fused path).
    T2, S2, B2, C2, H2 = 8, 16, 2, 64, 4
    q2 = jax.random.normal(k_q2, (T2, B2, C2), jnp.float32)
    k2 = jax.random.normal(k_k2, (S2, B2, C2), jnp.float32)
    v2 = jax.random.normal(k_v2, (S2, B2, C2), jnp.float32)
    params2 = make_params(k_p2, C2)
    prepped2 = prepare_params(params2, proj_value=False, fuse_qkv=False)
    fwd2 = jax.jit(functools.partial(mha_forward, num_heads=H2,
                                     proj_value=False, self_attn=False))
    out2 = jax.block_until_ready(fwd2(q2, k2, v2, prepped2))
    ref2 = mha_reference(q2, k2, v2, params2, num_heads=H2, proj_value=False)
    assert out2.shape == (T2, B2, C2)
    np.testing.assert_allclose(np.asarray(out2), np.asarray(ref2), rtol=5e-2, atol=5e-2)

    print("KERNEL_OK")
</pallas_src>

<mosaic_0001>
module attributes {stable_mosaic.version = 11 : i64} {
  func.func @_linear_kernel(%arg0: i32, %arg1: i32, %arg2: i32, %arg3: memref<32x128xbf16, #tpu.memory_space<vmem>>, %arg4: memref<128x384xbf16, #tpu.memory_space<vmem>>, %arg5: memref<1x384xf32, #tpu.memory_space<vmem>>, %arg6: memref<32x384xbf16, #tpu.memory_space<vmem>>, %arg7: memref<32x384xf32, #tpu.memory_space<vmem>>) attributes {dimension_semantics = [#tpu.dimension_semantics<parallel>, #tpu.dimension_semantics<parallel>, #tpu.dimension_semantics<arbitrary>], iteration_bounds = array<i64: 1, 1, 1>, scalar_prefetch = 0 : i64, scratch_operands = 1 : i64, tpu.core_type = #tpu.core_type<tc>, window_params = [{transform_indices = @transform_0, window_bounds = array<i64: 32, 128>}, {transform_indices = @transform_1, window_bounds = array<i64: 128, 384>}, {transform_indices = @transform_2, window_bounds = array<i64: 1, 384>}, {transform_indices = @transform_3, window_bounds = array<i64: 32, 384>}]} {
    %c0_i32 = arith.constant 0 : i32
    %0 = arith.cmpi eq, %arg2, %c0_i32 : i32
    %1 = arith.extui %0 : i1 to i32
    %c0_i32_0 = arith.constant 0 : i32
    %2 = arith.cmpi ne, %1, %c0_i32_0 : i32
    scf.if %2 {
      %cst_10 = arith.constant 0.000000e+00 : f32
      %12 = vector.broadcast %cst_10 : f32 to vector<32x384xf32>
      %c0_11 = arith.constant 0 : index
      %c0_12 = arith.constant 0 : index
      %13 = vector.load %arg7[%c0_11, %c0_12] : memref<32x384xf32, #tpu.memory_space<vmem>>, vector<32x384xf32>
      tpu.vector_store %arg7[%c0_11, %c0_12], %12 {strides = array<i32>} : memref<32x384xf32, #tpu.memory_space<vmem>>, vector<32x384xf32>,
    } else {
    }
    %c0 = arith.constant 0 : index
    %c0_1 = arith.constant 0 : index
    %3 = vector.load %arg7[%c0, %c0_1] : memref<32x384xf32, #tpu.memory_space<vmem>>, vector<32x384xf32>
    %c0_2 = arith.constant 0 : index
    %c0_3 = arith.constant 0 : index
    %4 = vector.load %arg3[%c0_2, %c0_3] : memref<32x128xbf16, #tpu.memory_space<vmem>>, vector<32x128xbf16>
    %c0_4 = arith.constant 0 : index
    %c0_5 = arith.constant 0 : index
    %5 = vector.load %arg4[%c0_4, %c0_5] : memref<128x384xbf16, #tpu.memory_space<vmem>>, vector<128x384xbf16>
    %cst = arith.constant dense<0.000000e+00> : vector<32x384xf32>
    %6 = tpu.matmul %4, %5, %cst {dimension_numbers = #tpu.dot_dimension_numbers<[1], [0], [0], [1], [0, 0, 1, 1], [], []>} : vector<32x128xbf16>, vector<128x384xbf16>, vector<32x384xf32> -> vector<32x384xf32>
    %7 = arith.addf %3, %6 : vector<32x384xf32>
    %c0_6 = arith.constant 0 : index
    %c0_7 = arith.constant 0 : index
    %8 = vector.load %arg7[%c0_6, %c0_7] : memref<32x384xf32, #tpu.memory_space<vmem>>, vector<32x384xf32>
    tpu.vector_store %arg7[%c0_6, %c0_7], %7 {strides = array<i32>} : memref<32x384xf32, #tpu.memory_space<vmem>>, vector<32x384xf32>,
    %c0_i32_8 = arith.constant 0 : i32
    %9 = arith.cmpi eq, %arg2, %c0_i32_8 : i32
    %10 = arith.extui %9 : i1 to i32
    %c0_i32_9 = arith.constant 0 : i32
    %11 = arith.cmpi ne, %10, %c0_i32_9 : i32
    scf.if %11 {
      %c0_10 = arith.constant 0 : index
      %c0_11 = arith.constant 0 : index
      %12 = vector.load %arg7[%c0_10, %c0_11] : memref<32x384xf32, #tpu.memory_space<vmem>>, vector<32x384xf32>
      %c0_12 = arith.constant 0 : index
      %c0_13 = arith.constant 0 : index
      %13 = vector.load %arg5[%c0_12, %c0_13] : memref<1x384xf32, #tpu.memory_space<vmem>>, vector<1x384xf32>
      %14 = vector.broadcast %13 : vector<1x384xf32> to vector<32x384xf32>
      %15 = arith.addf %12, %14 : vector<32x384xf32>
      %16 = arith.truncf %15 : vector<32x384xf32> to vector<32x384xbf16>
      %c0_14 = arith.constant 0 : index
      %c0_15 = arith.constant 0 : index
      %17 = vector.load %arg6[%c0_14, %c0_15] : memref<32x384xbf16, #tpu.memory_space<vmem>>, vector<32x384xbf16>
      tpu.vector_store %arg6[%c0_14, %c0_15], %16 {strides = array<i32>} : memref<32x384xbf16, #tpu.memory_space<vmem>>, vector<32x384xbf16>,
    } else {
    }
    return
  }
  func.func @transform_0(%arg0: i32, %arg1: i32, %arg2: i32) -> (i32, i32) {
    %c0_i32 = arith.constant 0 : i32
    return %arg0, %arg2 : i32, i32
  }
  func.func @transform_1(%arg0: i32, %arg1: i32, %arg2: i32) -> (i32, i32) {
    %c0_i32 = arith.constant 0 : i32
    return %arg2, %arg1 : i32, i32
  }
  func.func @transform_2(%arg0: i32, %arg1: i32, %arg2: i32) -> (i32, i32) {
    %c0_i32 = arith.constant 0 : i32
    %c0_i32_0 = arith.constant 0 : i32
    return %c0_i32, %arg1 : i32, i32
  }
  func.func @transform_3(%arg0: i32, %arg1: i32, %arg2: i32) -> (i32, i32) {
    %c0_i32 = arith.constant 0 : i32
    return %arg0, %arg1 : i32, i32
  }
}

module attributes {stable_mosaic.version = 11 : i64} {
  func.func @_linear_kernel(%arg0: i32, %arg1: i32, %arg2: i32, %arg3: memref<32x128xbf16, #tpu.memory_space<vmem>>, %arg4: memref<128x128xbf16, #tpu.memory_space<vmem>>, %arg5: memref<1x128xf32, #tpu.memory_space<vmem>>, %arg6: memref<32x128xf32, #tpu.memory_space<vmem>>, %arg7: memref<32x128xf32, #tpu.memory_space<vmem>>) attributes {dimension_semantics = [#tpu.dimension_semantics<parallel>, #tpu.dimension_semantics<parallel>, #tpu.dimension_semantics<arbitrary>], iteration_bounds = array<i64: 1, 1, 1>, scalar_prefetch = 0 : i64, scratch_operands = 1 : i64, tpu.core_type = #tpu.core_type<tc>, window_params = [{transform_indices = @transform_0, window_bounds = array<i64: 32, 128>}, {transform_indices = @transform_1, window_bounds = array<i64: 128, 128>}, {transform_indices = @transform_2, window_bounds = array<i64: 1, 128>}, {transform_indices = @transform_3, window_bounds = array<i64: 32, 128>}]} {
    %c0_i32 = arith.constant 0 : i32
    %0 = arith.cmpi eq, %arg2, %c0_i32 : i32
    %1 = arith.extui %0 : i1 to i32
    %c0_i32_0 = arith.constant 0 : i32
    %2 = arith.cmpi ne, %1, %c0_i32_0 : i32
    scf.if %2 {
      %cst_10 = arith.constant 0.000000e+00 : f32
      %12 = vector.broadcast %cst_10 : f32 to vector<32x128xf32>
      %c0_11 = arith.constant 0 : index
      %c0_12 = arith.constant 0 : index
      %13 = vector.load %arg7[%c0_11, %c0_12] : memref<32x128xf32, #tpu.memory_space<vmem>>, vector<32x128xf32>
      tpu.vector_store %arg7[%c0_11, %c0_12], %12 {strides = array<i32>} : memref<32x128xf32, #tpu.memory_space<vmem>>, vector<32x128xf32>,
    } else {
    }
    %c0 = arith.constant 0 : index
    %c0_1 = arith.constant 0 : index
    %3 = vector.load %arg7[%c0, %c0_1] : memref<32x128xf32, #tpu.memory_space<vmem>>, vector<32x128xf32>
    %c0_2 = arith.constant 0 : index
    %c0_3 = arith.constant 0 : index
    %4 = vector.load %arg3[%c0_2, %c0_3] : memref<32x128xbf16, #tpu.memory_space<vmem>>, vector<32x128xbf16>
    %c0_4 = arith.constant 0 : index
    %c0_5 = arith.constant 0 : index
    %5 = vector.load %arg4[%c0_4, %c0_5] : memref<128x128xbf16, #tpu.memory_space<vmem>>, vector<128x128xbf16>
    %cst = arith.constant dense<0.000000e+00> : vector<32x128xf32>
    %6 = tpu.matmul %4, %5, %cst {dimension_numbers = #tpu.dot_dimension_numbers<[1], [0], [0], [1], [0, 0, 1, 1], [], []>} : vector<32x128xbf16>, vector<128x128xbf16>, vector<32x128xf32> -> vector<32x128xf32>
    %7 = arith.addf %3, %6 : vector<32x128xf32>
    %c0_6 = arith.constant 0 : index
    %c0_7 = arith.constant 0 : index
    %8 = vector.load %arg7[%c0_6, %c0_7] : memref<32x128xf32, #tpu.memory_space<vmem>>, vector<32x128xf32>
    tpu.vector_store %arg7[%c0_6, %c0_7], %7 {strides = array<i32>} : memref<32x128xf32, #tpu.memory_space<vmem>>, vector<32x128xf32>,
    %c0_i32_8 = arith.constant 0 : i32
    %9 = arith.cmpi eq, %arg2, %c0_i32_8 : i32
    %10 = arith.extui %9 : i1 to i32
    %c0_i32_9 = arith.constant 0 : i32
    %11 = arith.cmpi ne, %10, %c0_i32_9 : i32
    scf.if %11 {
      %c0_10 = arith.constant 0 : index
      %c0_11 = arith.constant 0 : index
      %12 = vector.load %arg7[%c0_10, %c0_11] : memref<32x128xf32, #tpu.memory_space<vmem>>, vector<32x128xf32>
      %c0_12 = arith.constant 0 : index
      %c0_13 = arith.constant 0 : index
      %13 = vector.load %arg5[%c0_12, %c0_13] : memref<1x128xf32, #tpu.memory_space<vmem>>, vector<1x128xf32>
      %14 = vector.broadcast %13 : vector<1x128xf32> to vector<32x128xf32>
      %15 = arith.addf %12, %14 : vector<32x128xf32>
      %c0_14 = arith.constant 0 : index
      %c0_15 = arith.constant 0 : index
      %16 = vector.load %arg6[%c0_14, %c0_15] : memref<32x128xf32, #tpu.memory_space<vmem>>, vector<32x128xf32>
      tpu.vector_store %arg6[%c0_14, %c0_15], %15 {strides = array<i32>} : memref<32x128xf32, #tpu.memory_space<vmem>>, vector<32x128xf32>,
    } else {
    }
    return
  }
  func.func @transform_0(%arg0: i32, %arg1: i32, %arg2: i32) -> (i32, i32) {
    %c0_i32 = arith.constant 0 : i32
    return %arg0, %arg2 : i32, i32
  }
  func.func @transform_1(%arg0: i32, %arg1: i32, %arg2: i32) -> (i32, i32) {
    %c0_i32 = arith.constant 0 : i32
    return %arg2, %arg1 : i32, i32
  }
  func.func @transform_2(%arg0: i32, %arg1: i32, %arg2: i32) -> (i32, i32) {
    %c0_i32 = arith.constant 0 : i32
    %c0_i32_0 = arith.constant 0 : i32
    return %c0_i32, %arg1 : i32, i32
  }
  func.func @transform_3(%arg0: i32, %arg1: i32, %arg2: i32) -> (i32, i32) {
    %c0_i32 = arith.constant 0 : i32
    return %arg0, %arg1 : i32, i32
  }
}

module attributes {stable_mosaic.version = 11 : i64} {
  func.func @kernel(%arg0: i32, %arg1: i32, %arg2: memref<1x16x128xbf16, #tpu.memory_space<vmem>>, %arg3: memref<1x16x128xbf16, #tpu.memory_space<vmem>>, %arg4: memref<1x16x128xbf16, #tpu.memory_space<vmem>>, %arg5: memref<1x16x128xbf16, #tpu.memory_space<vmem>>) attributes {dimension_semantics = [#tpu.dimension_semantics<parallel>, #tpu.dimension_semantics<parallel>], iteration_bounds = array<i64: 2, 1>, scalar_prefetch = 0 : i64, scratch_operands = 0 : i64, tpu.core_type = #tpu.core_type<tc>, window_params = [{transform_indices = @transform_0, window_bounds = array<i64: 1, 16, 128>}, {transform_indices = @transform_1, window_bounds = array<i64: 1, 16, 128>}, {transform_indices = @transform_2, window_bounds = array<i64: 1, 16, 128>}, {transform_indices = @transform_3, window_bounds = array<i64: 1, 16, 128>}]} {
    %c0 = arith.constant 0 : index
    %c0_0 = arith.constant 0 : index
    %c0_1 = arith.constant 0 : index
    %0 = vector.load %arg2[%c0, %c0_0, %c0_1] : memref<1x16x128xbf16, #tpu.memory_space<vmem>>, vector<1x16x128xbf16>
    %1 = vector.shape_cast %0 : vector<1x16x128xbf16> to vector<16x128xbf16>
    %c0_2 = arith.constant 0 : index
    %c0_3 = arith.constant 0 : index
    %c0_4 = arith.constant 0 : index
    %2 = vector.load %arg3[%c0_2, %c0_3, %c0_4] : memref<1x16x128xbf16, #tpu.memory_space<vmem>>, vector<1x16x128xbf16>
    %3 = vector.shape_cast %2 : vector<1x16x128xbf16> to vector<16x128xbf16>
    %c0_5 = arith.constant 0 : index
    %c0_6 = arith.constant 0 : index
    %c0_7 = arith.constant 0 : index
    %4 = vector.load %arg4[%c0_5, %c0_6, %c0_7] : memref<1x16x128xbf16, #tpu.memory_space<vmem>>, vector<1x16x128xbf16>
    %5 = vector.shape_cast %4 : vector<1x16x128xbf16> to vector<16x128xbf16>
    %6 = vector.extract_strided_slice %1 {offsets = [0, 0], sizes = [16, 32], strides = [1, 1]} : vector<16x128xbf16> to vector<16x32xbf16>
    %7 = vector.extract_strided_slice %3 {offsets = [0, 0], sizes = [16, 32], strides = [1, 1]} : vector<16x128xbf16> to vector<16x32xbf16>
    %8 = vector.extract_strided_slice %5 {offsets = [0, 0], sizes = [16, 32], strides = [1, 1]} : vector<16x128xbf16> to vector<16x32xbf16>
    %cst = arith.constant dense<0.000000e+00> : vector<16x16xf32>
    %9 = tpu.matmul %6, %7, %cst {dimension_numbers = #tpu.dot_dimension_numbers<[1], [1], [0], [0], [0, 0, 1, 0], [], []>} : vector<16x32xbf16>, vector<16x32xbf16>, vector<16x16xf32> -> vector<16x16xf32>
    %cst_8 = arith.constant dense<0xFF800000> : vector<16xf32>
    %10 = vector.multi_reduction <maximumf>, %9, %cst_8 [1] : vector<16x16xf32> to vector<16xf32>
    %11 = vector.shape_cast %10 : vector<16xf32> to vector<16x1xf32>
    %12 = vector.broadcast %11 : vector<16x1xf32> to vector<16x16xf32>
    %13 = arith.subf %9, %12 : vector<16x16xf32>
    %14 = math.exp %13 : vector<16x16xf32>
    %cst_9 = arith.constant dense<0.000000e+00> : vector<16xf32>
    %15 = vector.multi_reduction <add>, %14, %cst_9 [1] : vector<16x16xf32> to vector<16xf32>
    %16 = vector.shape_cast %15 : vector<16xf32> to vector<16x1xf32>
    %17 = tpu.reciprocal %16 {approx = true} : vector<16x1xf32> -> vector<16x1xf32>
    %18 = arith.truncf %14 : vector<16x16xf32> to vector<16x16xbf16>
    %cst_10 = arith.constant dense<0.000000e+00> : vector<16x32xf32>
    %19 = tpu.matmul %18, %8, %cst_10 {dimension_numbers = #tpu.dot_dimension_numbers<[1], [0], [0], [1], [0, 0, 1, 1], [], []>} : vector<16x16xbf16>, vector<16x32xbf16>, vector<16x32xf32> -> vector<16x32xf32>
    %20 = vector.broadcast %17 : vector<16x1xf32> to vector<16x32xf32>
    %21 = arith.mulf %19, %20 : vector<16x32xf32>
    %22 = arith.truncf %21 : vector<16x32xf32> to vector<16x32xbf16>
    %c0_11 = arith.constant 0 : index
    %c0_12 = arith.constant 0 : index
    %c0_13 = arith.constant 0 : index
    %23 = vector.load %arg5[%c0_11, %c0_12, %c0_13] : memref<1x16x128xbf16, #tpu.memory_space<vmem>>, vector<1x16x32xbf16>
    %24 = vector.shape_cast %23 : vector<1x16x32xbf16> to vector<16x32xbf16>
    %25 = vector.shape_cast %22 : vector<16x32xbf16> to vector<1x16x32xbf16>
    tpu.vector_store %arg5[%c0_11, %c0_12, %c0_13], %25 {strides = array<i32>} : memref<1x16x128xbf16, #tpu.memory_space<vmem>>, vector<1x16x32xbf16>,
    %26 = vector.extract_strided_slice %1 {offsets = [0, 32], sizes = [16, 32], strides = [1, 1]} : vector<16x128xbf16> to vector<16x32xbf16>
    %27 = vector.extract_strided_slice %3 {offsets = [0, 32], sizes = [16, 32], strides = [1, 1]} : vector<16x128xbf16> to vector<16x32xbf16>
    %28 = vector.extract_strided_slice %5 {offsets = [0, 32], sizes = [16, 32], strides = [1, 1]} : vector<16x128xbf16> to vector<16x32xbf16>
    %cst_14 = arith.constant dense<0.000000e+00> : vector<16x16xf32>
    %29 = tpu.matmul %26, %27, %cst_14 {dimension_numbers = #tpu.dot_dimension_numbers<[1], [1], [0], [0], [0, 0, 1, 0], [], []>} : vector<16x32xbf16>, vector<16x32xbf16>, vector<16x16xf32> -> vector<16x16xf32>
    %cst_15 = arith.constant dense<0xFF800000> : vector<16xf32>
    %30 = vector.multi_reduction <maximumf>, %29, %cst_15 [1] : vector<16x16xf32> to vector<16xf32>
    %31 = vector.shape_cast %30 : vector<16xf32> to vector<16x1xf32>
    %32 = vector.broadcast %31 : vector<16x1xf32> to vector<16x16xf32>
    %33 = arith.subf %29, %32 : vector<16x16xf32>
    %34 = math.exp %33 : vector<16x16xf32>
    %cst_16 = arith.constant dense<0.000000e+00> : vector<16xf32>
    %35 = vector.multi_reduction <add>, %34, %cst_16 [1] : vector<16x16xf32> to vector<16xf32>
    %36 = vector.shape_cast %35 : vector<16xf32> to vector<16x1xf32>
    %37 = tpu.reciprocal %36 {approx = true} : vector<16x1xf32> -> vector<16x1xf32>
    %38 = arith.truncf %34 : vector<16x16xf32> to vector<16x16xbf16>
    %cst_17 = arith.constant dense<0.000000e+00> : vector<16x32xf32>
    %39 = tpu.matmul %38, %28, %cst_17 {dimension_numbers = #tpu.dot_dimension_numbers<[1], [0], [0], [1], [0, 0, 1, 1], [], []>} : vector<16x16xbf16>, vector<16x32xbf16>, vector<16x32xf32> -> vector<16x32xf32>
    %40 = vector.broadcast %37 : vector<16x1xf32> to vector<16x32xf32>
    %41 = arith.mulf %39, %40 : vector<16x32xf32>
    %42 = arith.truncf %41 : vector<16x32xf32> to vector<16x32xbf16>
    %c0_18 = arith.constant 0 : index
    %c0_19 = arith.constant 0 : index
    %c32 = arith.constant 32 : index
    %43 = vector.load %arg5[%c0_18, %c0_19, %c32] : memref<1x16x128xbf16, #tpu.memory_space<vmem>>, vector<1x16x32xbf16>
    %44 = vector.shape_cast %43 : vector<1x16x32xbf16> to vector<16x32xbf16>
    %45 = vector.shape_cast %42 : vector<16x32xbf16> to vector<1x16x32xbf16>
    tpu.vector_store %arg5[%c0_18, %c0_19, %c32], %45 {strides = array<i32>} : memref<1x16x128xbf16, #tpu.memory_space<vmem>>, vector<1x16x32xbf16>,
    %46 = vector.extract_strided_slice %1 {offsets = [0, 64], sizes = [16, 32], strides = [1, 1]} : vector<16x128xbf16> to vector<16x32xbf16>
    %47 = vector.extract_strided_slice %3 {offsets = [0, 64], sizes = [16, 32], strides = [1, 1]} : vector<16x128xbf16> to vector<16x32xbf16>
    %48 = vector.extract_strided_slice %5 {offsets = [0, 64], sizes = [16, 32], strides = [1, 1]} : vector<16x128xbf16> to vector<16x32xbf16>
    %cst_20 = arith.constant dense<0.000000e+00> : vector<16x16xf32>
    %49 = tpu.matmul %46, %47, %cst_20 {dimension_numbers = #tpu.dot_dimension_numbers<[1], [1], [0], [0], [0, 0, 1, 0], [], []>} : vector<16x32xbf16>, vector<16x32xbf16>, vector<16x16xf32> -> vector<16x16xf32>
    %cst_21 = arith.constant dense<0xFF800000> : vector<16xf32>
    %50 = vector.multi_reduction <maximumf>, %49, %cst_21 [1] : vector<16x16xf32> to vector<16xf32>
    %51 = vector.shape_cast %50 : vector<16xf32> to vector<16x1xf32>
    %52 = vector.broadcast %51 : vector<16x1xf32> to vector<16x16xf32>
    %53 = arith.subf %49, %52 : vector<16x16xf32>
    %54 = math.exp %53 : vector<16x16xf32>
    %cst_22 = arith.constant dense<0.000000e+00> : vector<16xf32>
    %55 = vector.multi_reduction <add>, %54, %cst_22 [1] : vector<16x16xf32> to vector<16xf32>
    %56 = vector.shape_cast %55 : vector<16xf32> to vector<16x1xf32>
    %57 = tpu.reciprocal %56 {approx = true} : vector<16x1xf32> -> vector<16x1xf32>
    %58 = arith.truncf %54 : vector<16x16xf32> to vector<16x16xbf16>
    %cst_23 = arith.constant dense<0.000000e+00> : vector<16x32xf32>
    %59 = tpu.matmul %58, %48, %cst_23 {dimension_numbers = #tpu.dot_dimension_numbers<[1], [0], [0], [1], [0, 0, 1, 1], [], []>} : vector<16x16xbf16>, vector<16x32xbf16>, vector<16x32xf32> -> vector<16x32xf32>
    %60 = vector.broadcast %57 : vector<16x1xf32> to vector<16x32xf32>
    %61 = arith.mulf %59, %60 : vector<16x32xf32>
    %62 = arith.truncf %61 : vector<16x32xf32> to vector<16x32xbf16>
    %c0_24 = arith.constant 0 : index
    %c0_25 = arith.constant 0 : index
    %c64 = arith.constant 64 : index
    %63 = vector.load %arg5[%c0_24, %c0_25, %c64] : memref<1x16x128xbf16, #tpu.memory_space<vmem>>, vector<1x16x32xbf16>
    %64 = vector.shape_cast %63 : vector<1x16x32xbf16> to vector<16x32xbf16>
    %65 = vector.shape_cast %62 : vector<16x32xbf16> to vector<1x16x32xbf16>
    tpu.vector_store %arg5[%c0_24, %c0_25, %c64], %65 {strides = array<i32>} : memref<1x16x128xbf16, #tpu.memory_space<vmem>>, vector<1x16x32xbf16>,
    %66 = vector.extract_strided_slice %1 {offsets = [0, 96], sizes = [16, 32], strides = [1, 1]} : vector<16x128xbf16> to vector<16x32xbf16>
    %67 = vector.extract_strided_slice %3 {offsets = [0, 96], sizes = [16, 32], strides = [1, 1]} : vector<16x128xbf16> to vector<16x32xbf16>
    %68 = vector.extract_strided_slice %5 {offsets = [0, 96], sizes = [16, 32], strides = [1, 1]} : vector<16x128xbf16> to vector<16x32xbf16>
    %cst_26 = arith.constant dense<0.000000e+00> : vector<16x16xf32>
    %69 = tpu.matmul %66, %67, %cst_26 {dimension_numbers = #tpu.dot_dimension_numbers<[1], [1], [0], [0], [0, 0, 1, 0], [], []>} : vector<16x32xbf16>, vector<16x32xbf16>, vector<16x16xf32> -> vector<16x16xf32>
    %cst_27 = arith.constant dense<0xFF800000> : vector<16xf32>
    %70 = vector.multi_reduction <maximumf>, %69, %cst_27 [1] : vector<16x16xf32> to vector<16xf32>
    %71 = vector.shape_cast %70 : vector<16xf32> to vector<16x1xf32>
    %72 = vector.broadcast %71 : vector<16x1xf32> to vector<16x16xf32>
    %73 = arith.subf %69, %72 : vector<16x16xf32>
    %74 = math.exp %73 : vector<16x16xf32>
    %cst_28 = arith.constant dense<0.000000e+00> : vector<16xf32>
    %75 = vector.multi_reduction <add>, %74, %cst_28 [1] : vector<16x16xf32> to vector<16xf32>
    %76 = vector.shape_cast %75 : vector<16xf32> to vector<16x1xf32>
    %77 = tpu.reciprocal %76 {approx = true} : vector<16x1xf32> -> vector<16x1xf32>
    %78 = arith.truncf %74 : vector<16x16xf32> to vector<16x16xbf16>
    %cst_29 = arith.constant dense<0.000000e+00> : vector<16x32xf32>
    %79 = tpu.matmul %78, %68, %cst_29 {dimension_numbers = #tpu.dot_dimension_numbers<[1], [0], [0], [1], [0, 0, 1, 1], [], []>} : vector<16x16xbf16>, vector<16x32xbf16>, vector<16x32xf32> -> vector<16x32xf32>
    %80 = vector.broadcast %77 : vector<16x1xf32> to vector<16x32xf32>
    %81 = arith.mulf %79, %80 : vector<16x32xf32>
    %82 = arith.truncf %81 : vector<16x32xf32> to vector<16x32xbf16>
    %c0_30 = arith.constant 0 : index
    %c0_31 = arith.constant 0 : index
    %c96 = arith.constant 96 : index
    %83 = vector.load %arg5[%c0_30, %c0_31, %c96] : memref<1x16x128xbf16, #tpu.memory_space<vmem>>, vector<1x16x32xbf16>
    %84 = vector.shape_cast %83 : vector<1x16x32xbf16> to vector<16x32xbf16>
    %85 = vector.shape_cast %82 : vector<16x32xbf16> to vector<1x16x32xbf16>
    tpu.vector_store %arg5[%c0_30, %c0_31, %c96], %85 {strides = array<i32>} : memref<1x16x128xbf16, #tpu.memory_space<vmem>>, vector<1x16x32xbf16>,
    return
  }
  func.func @transform_0(%arg0: i32, %arg1: i32) -> (i32, i32, i32) {
    %c0_i32 = arith.constant 0 : i32
    %c0_i32_0 = arith.constant 0 : i32
    return %arg0, %arg1, %c0_i32 : i32, i32, i32
  }
  func.func @transform_1(%arg0: i32, %arg1: i32) -> (i32, i32, i32) {
    %c0_i32 = arith.constant 0 : i32
    %c1_i32 = arith.constant 1 : i32
    %c0_i32_0 = arith.constant 0 : i32
    return %arg0, %c0_i32, %c1_i32 : i32, i32, i32
  }
  func.func @transform_2(%arg0: i32, %arg1: i32) -> (i32, i32, i32) {
    %c0_i32 = arith.constant 0 : i32
    %c2_i32 = arith.constant 2 : i32
    %c0_i32_0 = arith.constant 0 : i32
    return %arg0, %c0_i32, %c2_i32 : i32, i32, i32
  }
  func.func @transform_3(%arg0: i32, %arg1: i32) -> (i32, i32, i32) {
    %c0_i32 = arith.constant 0 : i32
    %c0_i32_0 = arith.constant 0 : i32
    return %arg0, %arg1, %c0_i32 : i32, i32, i32
  }
}

</mosaic_0001>

<bundles_post_ra>
// kernel: mha_forward.5
= control target key start
LH: loop header
LB: loop body
LE: loop exit
PB: predicated region body
PF: predicated region fallthrough
CT: control target
= control target key end

     0   :  { %s306_s1 = inlined_call_operand.vmem [shape: bf16[128,128], index: 1, kind: input, shape index: {}]   ;;  %s307_s0 = inlined_call_operand.vmem [shape: bf16[32,128], index: 0, kind: input, shape index: {}]   ;;  %s308_s2 = inlined_call_operand.vmem [shape: f32[1,128], index: 2, kind: input, shape index: {}]   ;;  %s309_s3 = inlined_call_operand.vmem [shape: f32[32,128], index: 3, kind: output, shape index: {}]  }
   0x1   :  { %v231_v0 = vld [vmem:[%s306_s1] sm:$0xff]   ;;  %v232_v1 = vld [vmem:[%s306_s1 + $0x8] sm:$0xff]   ;;  %v233_v2 = vld [vmem:[%s306_s1 + $0x10] sm:$0xff]  }
   0x2   :  { %211 = vmatprep.subr.bf16.mxu0 %v231_v0  ;;  %v234_v3 = vld [vmem:[%s306_s1 + $0x18] sm:$0xff]   ;;  %v239_v4 = vld [vmem:[%s307_s0] sm:$0xff]   ;;  %v236_v6 = vld [vmem:[%s306_s1 + $0x28] sm:$0xff]  }
   0x3   :  { %212 = vmatpush3.bf16.msra.mxu0 %v231_v0  ;;  %227 = vmatprep.mubr.bf16.mxu0 %v239_v4  ;;  %v235_v5 = vld [vmem:[%s306_s1 + $0x20] sm:$0xff]   ;;  %v237_v7 = vld [vmem:[%s306_s1 + $0x30] sm:$0xff]   ;;  %v238_v8 = vld [vmem:[%s306_s1 + $0x38] sm:$0xff]  }
   0x4   :  { %213 = vmatprep.subr.bf16.mxu0 %v232_v1  ;;  %v240_v9 = vld [vmem:[%s307_s0 + $0x8] sm:$0xff]   ;;  %v200_v10 = vld [vmem:[%s308_s2] ss:$0 sm:$0xff] }
   0x7   :  { %214 = vmatpush3.bf16.msra.mxu0 %v232_v1 }
   0x8   :  { %215 = vmatprep.subr.bf16.mxu0 %v233_v2 }
   0xb   :  { %216 = vmatpush3.bf16.msra.mxu0 %v233_v2 }
   0xc   :  { %217 = vmatprep.subr.bf16.mxu0 %v234_v3 }
   0xf   :  { %218 = vmatpush3.bf16.msra.mxu0 %v234_v3 }
  0x10   :  { %219 = vmatprep.subr.bf16.mxu0 %v235_v5 }
  0x13   :  { %220 = vmatpush3.bf16.msra.mxu0 %v235_v5 }
  0x14   :  { %221 = vmatprep.subr.bf16.mxu0 %v236_v6 }
  0x17   :  { %222 = vmatpush3.bf16.msra.mxu0 %v236_v6 }
  0x18   :  { %223 = vmatprep.subr.bf16.mxu0 %v237_v7 }
  0x1b   :  { %224 = vmatpush3.bf16.msra.mxu0 %v237_v7 }
  0x1c   :  { %225 = vmatprep.subr.bf16.mxu0 %v238_v8 }
  0x1f   :  { %226 = vmatpush3.bf16.msra.mxu0 %v238_v8 }
  0x22   :  { %228 = vmatmul.mubr.bf16.vlgmr.msra.gmra.mrb[0].mxu0 %v240_v9 }
  0xf5   :  { %v229_v11 = vpop.f32.mrb[0].mxu0 }
  0xf6   :  { %v180_v12 = vadd.f32 %v229_v11, %v200_v10  ;;  %v141_v13 = vpop.f32.mrb[1].mxu0 }
  0xf7   :  { %v178_v14 = vadd.f32 %v200_v10, %v141_v13  ;;  %v230_v15 = vpop.f32.mrb[2].mxu0 }
  0xf8   :  { %184 = vst [vmem:[%s309_s3 + $0x10] sm:$0xff] %v180_v12  ;;  %v181_v16 = vadd.f32 %v230_v15, %v200_v10  ;;  %v144_v17 = vpop.f32.mrb[3].mxu0 }
  0xf9   :  { %182 = vst [vmem:[%s309_s3] sm:$0xff] %v178_v14  ;;  %v179_v18 = vadd.f32 %v200_v10, %v144_v17 }
  0xfa   :  { %185 = vst [vmem:[%s309_s3 + $0x18] sm:$0xff] %v181_v16 }
  0xfb   :  { %183 = vst [vmem:[%s309_s3 + $0x8] sm:$0xff] %v179_v18 }

// kernel: mha_forward.3
= control target key start
LH: loop header
LB: loop body
LE: loop exit
PB: predicated region body
PF: predicated region fallthrough
CT: control target
= control target key end

     0   :  { %8 = vsyncpa [#allocation4], 0  ;;  %s590_s12 = smov [#allocation3]   ;;  %s659_s0 = inlined_call_operand.vmem [shape: bf16[32,128], index: 0, kind: input, shape index: {}]   ;;  %s660_s1 = inlined_call_operand.hbm [shape: bf16[128,384], index: 1, kind: input, shape index: {}]   ;;  %s661_s2 = inlined_call_operand.vmem [shape: f32[1,384], index: 2, kind: input, shape index: {}]   ;;  %s662_s3 = inlined_call_operand.vmem [shape: bf16[32,384], index: 3, kind: output, shape index: {}]  }
   0x1   :  { %s16_s13 = sshll.u32 %s590_s12, 4  ;;  %s566_s16 = scalar_lea.hbm %s660_s1, 3072  ;;  %s17_s13 = int_to_ptr.vmem [resolvable:$true] %s16_s13 }
   0x2   :  { %p567_p0 = scmp.ne.s32.totalorder %s660_s1, %s566_s16  ;;  %p570_p1 = scmp.lt.u32.totalorder %s566_s16, %s660_s1 }
   0x4   :  { %p572_p2 = pnand %p570_p1, %p567_p0 }
   0x6   :  { %575 = shalt.err (!%p572_p2)
}
   0x7   :  { %s576_s21 = scalar_lea.vmem %s17_s13, 3072  ;;  %p581_p4 = scmp.lt.s32.totalorder %s17_s13, %s17_s13 }
   0x8   :  { %p577_p3 = scmp.ne.s32.totalorder %s17_s13, %s576_s21  ;;  %p582_p5 = scmp.lt.s32.totalorder %s576_s21, %s576_s21 }
   0xa   :  { %p583_p6 = por %p582_p5, %p581_p4 }
   0xc   :  { %p584_p7 = pnand %p583_p6, %p577_p3 }
   0xe   :  { %587 = shalt.err (!%p584_p7)
}
   0xf   :  { %s591_s22 = smov 192   ;;  %s592_s23 = smov 12  }
  0x10   :  { %22 = dma.hbm_to_vmem [thread:$0]  %s660_s1, 3072, %s17_s13, [#allocation4], %s591_s22, %s591_s22, %s592_s23  }
  0x11   :  { %588 = dma.done.wait [#allocation4], 3072  }
  0x12   :  { %589 = vsyncadd [#allocation4], 4294964224  ;;  %v593_v0 = vmov 0   ;;  %v532_v1 = vld [vmem:[#allocation3 + $0x4] ss:$12 sps:$4 sm:$0xff]   ;;  %v565_v26 = vld [vmem:[%s659_s0 + $0x8] sm:$0xff]   ;;  %v376_v27 = vlaneseq }
  0x13   :  { %265 = vmatprep.mubr.bf16.mxu0 %v593_v0  ;;  %v534_v2 = vld [vmem:[#allocation3] ss:$12 sps:$4 sm:$0xff]   ;;  %233 = vmatprep.subr.bf16.mxu0 %v532_v1  ;;  %v535_v3 = vld [vmem:[#allocation3 + $0x1c] ss:$12 sps:$4 sm:$0xff]   ;;  %v537_v4 = vld [vmem:[#allocation3 + $0x18] ss:$12 sps:$4 sm:$0xff]  }
  0x14   :  { %234 = vmatpush1.bf16.msra.mxu0 %v534_v2  ;;  %v538_v5 = vld [vmem:[#allocation3 + $0x8] ss:$12 sps:$4 sm:$0xff]   ;;  %v542_v7 = vld [vmem:[#allocation3 + $0x20] ss:$12 sps:$4 sm:$0xff]   ;;  %v541_v8 = vld [vmem:[#allocation3 + $0x30] ss:$12 sps:$4 sm:$0xff]  }
  0x15   :  { %235 = vmatprep.subr.bf16.mxu0 %v535_v3  ;;  %v539_v6 = vld [vmem:[#allocation3 + $0x34] ss:$12 sps:$4 sm:$0xff]   ;;  %508 = vmatprep.subr.bf16.mxu1 %v538_v5  ;;  %v543_v9 = vld [vmem:[#allocation3 + $0x4c] ss:$12 sps:$4 sm:$0xff]   ;;  %v550_v12 = vld [vmem:[#allocation3 + $0x50] ss:$12 sps:$4 sm:$0xff]  }
  0x16   :  { %509 = vmatpush3.bf16.msra.mxu1 %v538_v5  ;;  %v546_v10 = vld [vmem:[#allocation3 + $0x38] ss:$12 sps:$4 sm:$0xff]   ;;  %v545_v11 = vld [vmem:[#allocation3 + $0x48] ss:$12 sps:$4 sm:$0xff]   ;;  %v549_v14 = vld [vmem:[#allocation3 + $0x60] ss:$12 sps:$4 sm:$0xff]  }
  0x17   :  { %510 = vmatprep.subr.bf16.mxu1 %v542_v7  ;;  %v547_v13 = vld [vmem:[#allocation3 + $0x64] ss:$12 sps:$4 sm:$0xff]   ;;  %v554_v15 = vld [vmem:[#allocation3 + $0x68] ss:$12 sps:$4 sm:$0xff]   ;;  %v558_v19 = vld [vmem:[#allocation3 + $0x80] ss:$12 sps:$4 sm:$0xff]  }
  0x18   :  { %236 = vmatpush1.bf16.msra.mxu0 %v537_v4  ;;  %v551_v16 = vld [vmem:[#allocation3 + $0x7c] ss:$12 sps:$4 sm:$0xff]   ;;  %v553_v17 = vld [vmem:[#allocation3 + $0x78] ss:$12 sps:$4 sm:$0xff]   ;;  %v555_v20 = vld [vmem:[#allocation3 + $0x94] ss:$12 sps:$4 sm:$0xff]  }
  0x19   :  { %237 = vmatprep.subr.bf16.mxu0 %v539_v6  ;;  %v563_v18 = vld [vmem:[%s659_s0] sm:$0xff]   ;;  %v557_v21 = vld [vmem:[#allocation3 + $0x90] ss:$12 sps:$4 sm:$0xff]   ;;  %v559_v23 = vld [vmem:[#allocation3 + $0xac] ss:$12 sps:$4 sm:$0xff]   ;;  %v377_v28 = vshrl.u32 %v376_v27, 7 }
  0x1a   :  { %511 = vmatpush3.bf16.msra.mxu1 %v542_v7  ;;  %524 = vmatprep.mubr.bf16.mxu1 %v563_v18  ;;  %v562_v22 = vld [vmem:[#allocation3 + $0x98] ss:$12 sps:$4 sm:$0xff]   ;;  %v561_v24 = vld [vmem:[#allocation3 + $0xa8] ss:$12 sps:$4 sm:$0xff]   ;;  %v564_v25 = vld [vmem:[#allocation3 + $0xb0] ss:$12 sps:$4 sm:$0xff]  }
  0x1b   :  { %512 = vmatprep.subr.bf16.mxu1 %v546_v10  ;;  %v378_v29 = vsub.s32 0, %v377_v28  ;;  %v374_v30 = vld [vmem:[%s661_s2] sm:$0x7]  ;;  %v382_v31 = vsub.s32 1, %v377_v28  ;;  %v386_v32 = vsub.s32 2, %v377_v28 }
  0x1c   :  { %238 = vmatpush1.bf16.msra.mxu0 %v541_v8 }
  0x1d   :  { %239 = vmatprep.subr.bf16.mxu0 %v543_v9  ;;  %v379_v33 = vrot.slane %v374_v30, %v378_v29  ;;  %v383_v34 = vrot.slane %v374_v30, %v382_v31  ;;  %v387_v36 = vrot.slane %v374_v30, %v386_v32 }
  0x1e   :  { %513 = vmatpush3.bf16.msra.mxu1 %v546_v10 }
  0x1f   :  { %514 = vmatprep.subr.bf16.mxu1 %v550_v12 }
  0x20   :  { %240 = vmatpush1.bf16.msra.mxu0 %v545_v11 }
  0x21   :  { %241 = vmatprep.subr.bf16.mxu0 %v547_v13 }
  0x22   :  { %515 = vmatpush3.bf16.msra.mxu1 %v550_v12 }
  0x23   :  { %516 = vmatprep.subr.bf16.mxu1 %v554_v15 }
  0x24   :  { %242 = vmatpush1.bf16.msra.mxu0 %v549_v14 }
  0x25   :  { %243 = vmatprep.subr.bf16.mxu0 %v551_v16 }
  0x26   :  { %517 = vmatpush3.bf16.msra.mxu1 %v554_v15 }
  0x27   :  { %518 = vmatprep.subr.bf16.mxu1 %v558_v19 }
  0x28   :  { %244 = vmatpush1.bf16.msra.mxu0 %v553_v17 }
  0x29   :  { %245 = vmatprep.subr.bf16.mxu0 %v555_v20 }
  0x2a   :  { %519 = vmatpush3.bf16.msra.mxu1 %v558_v19 }
  0x2b   :  { %520 = vmatprep.subr.bf16.mxu1 %v562_v22 }
  0x2c   :  { %246 = vmatpush1.bf16.msra.mxu0 %v557_v21 }
  0x2d   :  { %247 = vmatprep.subr.bf16.mxu0 %v559_v23 }
  0x2e   :  { %521 = vmatpush3.bf16.msra.mxu1 %v562_v22 }
  0x2f   :  { %522 = vmatprep.subr.bf16.mxu1 %v564_v25 }
  0x30   :  { %248 = vmatpush1.bf16.msra.mxu0 %v561_v24 }
  0x32   :  { %523 = vmatpush3.bf16.msra.mxu1 %v564_v25 }
  0x33   :  { %266 = vmatmul.mubr.bf16.vlgmr.msra.gmra.mrb[0].mxu0 %v563_v18 }
  0x34   :  { %275 = vmatprep.mubr.bf16.mxu0 %v593_v0 }
  0x35   :  { %525 = vmatmul.mubr.bf16.vlgmr.msra.gmra.mrb[0].mxu1 %v565_v26 }
  0x3b   :  { %276 = vmatmul.mubr.bf16.gmra.mrb[4].mxu0 %v565_v26 }
 0x106   :  { %v267_v35 = vpop.f32.mrb[0].mxu0 }
 0x107   :  { %v391_v37 = vadd.f32 %v379_v33, %v267_v35  ;;  %v269_v38 = vpop.f32.mrb[1].mxu0 }
 0x108   :  { %v392_v39 = vadd.f32 %v383_v34, %v269_v38  ;;  %v271_v40 = vpop.f32.mrb[2].mxu0  ;;  %v526_v43 = vpop.f32.mrb[0].mxu1 }
 0x109   :  { %v394_v41 = vadd.f32 %v379_v33, %v271_v40  ;;  %v273_v42 = vpop.f32.mrb[3].mxu0  ;;  %v399_v46 = vadd.f32 %v526_v43, %v387_v36  ;;  %v320_v47 = vpop.f32.mrb[1].mxu1 }
 0x10a   :  { %v490_v44 = vpack.c.bf16 %v392_v39, %v391_v37  ;;  %v395_v45 = vadd.f32 %v383_v34, %v273_v42  ;;  %v393_v48 = vadd.f32 %v387_v36, %v320_v47  ;;  %v527_v49 = vpop.f32.mrb[2].mxu1 }
 0x10b   :  { %v495_v51 = vpack.c.bf16 %v399_v46, %v399_v46  ;;  %v402_v52 = vadd.f32 %v527_v49, %v387_v36  ;;  %v323_v53 = vpop.f32.mrb[3].mxu1 }
 0x10c   :  { %443 = vst [vmem:[%s662_s3] sm:$0xff] %v490_v44  ;;  %v492_v50 = vpack.c.bf16 %v395_v45, %v394_v41  ;;  %v491_v54 = vpack.c.bf16 %v393_v48, %v393_v48  ;;  %v396_v55 = vadd.f32 %v387_v36, %v323_v53 }
 0x10d   :  { %448 = vst [vmem:[%s662_s3 + $0x20] sm:$0xf] %v495_v51  ;;  %v497_v56 = vpack.c.bf16 %v402_v52, %v402_v52 }
 0x10e   :  { %445 = vst [vmem:[%s662_s3 + $0xc] sm:$0xff] %v492_v50  ;;  %v277_v57 = vpop.f32.mrb[4].mxu0  ;;  %444 = vst [vmem:[%s662_s3 + $0x8] sm:$0xf] %v491_v54  ;;  %v493_v59 = vpack.c.bf16 %v396_v55, %v396_v55 }
 0x10f   :  { %v397_v58 = vadd.f32 %v379_v33, %v277_v57  ;;  %v279_v60 = vpop.f32.mrb[5].mxu0  ;;  %450 = vst [vmem:[%s662_s3 + $0x2c] sm:$0xf] %v497_v56 }
 0x110   :  { %v398_v61 = vadd.f32 %v383_v34, %v279_v60  ;;  %v281_v62 = vpop.f32.mrb[6].mxu0  ;;  %446 = vst [vmem:[%s662_s3 + $0x14] sm:$0xf] %v493_v59 }
 0x111   :  { %v400_v63 = vadd.f32 %v379_v33, %v281_v62  ;;  %v283_v0 = vpop.f32.mrb[7].mxu0 }
 0x112   :  { %v494_v1 = vpack.c.bf16 %v398_v61, %v397_v58  ;;  %v401_v2 = vadd.f32 %v383_v34, %v283_v0 }
 0x114   :  { %447 = vst [vmem:[%s662_s3 + $0x18] sm:$0xff] %v494_v1  ;;  %v496_v3 = vpack.c.bf16 %v401_v2, %v400_v63 }
 0x116   :  { %449 = vst [vmem:[%s662_s3 + $0x24] sm:$0xff] %v496_v3 }
 0x117   :  { %455 = vsyncpa [#allocation4], 1 }

// kernel: mha_forward.4
= control target key start
LH: loop header
LB: loop body
LE: loop exit
PB: predicated region body
PF: predicated region fallthrough
CT: control target
= control target key end

     0   :  { %s1328_s12 = smov 0   ;;  %s1330_s13 = smov 0   ;;  %s1518_s0 = inlined_call_operand.vmem [shape: bf16[2,16,384], index: 0, kind: input, shape index: {}, may-alias: {0,1,2}]   ;;  %s1519_s1 = inlined_call_operand.vmem [shape: bf16[2,16,384], index: 1, kind: input, shape index: {}, may-alias: {0,1,2}]   ;;  %s1520_s2 = inlined_call_operand.vmem [shape: bf16[2,16,384], index: 2, kind: input, shape index: {}, may-alias: {0,1,2}]   ;;  %s1521_s3 = inlined_call_operand.vmem [shape: bf16[2,16,128], index: 3, kind: output, shape index: {}]  }
   0x1   :  { %s1332_s14 = smov 0   ;;  %s1334_s15 = smov 0  }
   0x2   :  { %s1336_s16 = smov 0  }
   0x3 LB: > { %s25_s17 = sadd.s32 1, %s1297_s15  ;;  %p41_p1 = scmp.ne.s32.totalorder %s1289_s13, %s1285_s12  ;;  %s1301_s16 = sphi %s1336_s16, %s13_s16   ;;  %s1297_s15 = sphi %s1334_s15, %s1526_s15   ;;  %s1293_s14 = sphi %s1332_s14, %s1525_s14   ;;  %s1289_s13 = sphi %s1330_s13, %s1524_s13   ;;  %s1285_s12 = sphi %s1328_s12, %s1523_s12  }
   0x4   : > { %p27_p0 = scmp.ge.s32.totalorder %s25_s17, 2  ;;  %p42_p2 = scmp.eq.s32.totalorder %s1301_s16, 0 }
   0x5   : > { %s34_s20 = sadd.s32 1, %s1289_s13  ;;  %p1071_p5 = scmp.ge.s32.totalorder %s1301_s16, 2 }
   0x6   : > { %s1528_s17 = smov (%p27_p0, %s25_s17), 0  ;;  %p1359_p3 = por %p42_p2, %p41_p1 }
   0x7   : > { %s29_s19 = ssub.s32 %s1297_s15, %s1528_s17  ;;  %147 = sbr.rel (%p1071_p5) target bundleno = 35 (0x23), region = 16 }
   0x8   : > { %p32_p4 = scmp.eq.s32.totalorder %s29_s19, 0 }
   0xa   : > { %s1367_s21 = scalar_select %p32_p4, %s1289_s13, %s34_s20  }
   0xe   : > { %150 = sbr.rel (!%p1359_p3) target bundleno = 21 (0x15), region = 20  ;;  %s152_s22 = sand.u32 (%p1359_p3), 1, %s1289_s13  }
   0xf   : > { %s1182_s23 = smul.u32 (%p1359_p3), 24, %s1297_s15  ;;  %s1072_s24 = sshll.u32 (%p1359_p3), %s152_s22, 3 }
  0x10   : > { %s154_s28 = scalar_lea.vmem (%p1359_p3), [#allocation2], %s1072_s24 }
  0x11   : > { %s160_s27 = scalar_lea.vmem (%p1359_p3), %s1518_s0, %s1182_s23 }
  0x12   : > { %v176_v0 = vld [vmem:[%s160_s27] sm:$0xf] (%p1359_p3)  ;;  %v178_v1 = vld [vmem:[%s160_s27 + $0xc] sm:$0xf] (%p1359_p3) }
  0x13   : > { %177 = vst [vmem:[%s154_s28] sm:$0xf] (%p1359_p3), %v176_v0  ;;  %179 = vst [vmem:[%s154_s28 + $0x4] sm:$0xf] (%p1359_p3), %v178_v1 }
  0x15 PF: > { %206 = sbr.rel (!%p1359_p3) target bundleno = 28 (0x1c), region = 61  ;;  %s208_s29 = sand.u32 (%p1359_p3), 1, %s1289_s13  }
  0x16   : > { %s1075_s30 = smul.u32 (%p1359_p3), 24, %s1297_s15  ;;  %s1074_s4 = sshll.u32 (%p1359_p3), %s208_s29, 3 }
  0x17   : > { %s210_s8 = scalar_lea.vmem (%p1359_p3), [#allocation3], %s1074_s4 }
  0x18   : > { %s979_s7 = scalar_lea.vmem (%p1359_p3), %s1519_s1, %s1075_s30 }
  0x19   : > { %v1076_v2 = vld [vmem:[%s979_s7 + $0x4] sm:$0xf] (%p1359_p3)  ;;  %v1077_v3 = vld [vmem:[%s979_s7 + $0x10] sm:$0xf] (%p1359_p3) }
  0x1a   : > { %231 = vst [vmem:[%s210_s8] sm:$0xf] (%p1359_p3), %v1076_v2  ;;  %233 = vst [vmem:[%s210_s8 + $0x4] sm:$0xf] (%p1359_p3), %v1077_v3 }
  0x1c PF: > { %260 = sbr.rel (!%p1359_p3) target bundleno = 35 (0x23), region = 102  ;;  %s262_s9 = sand.u32 (%p1359_p3), 1, %s1289_s13  }
  0x1d   : > { %s1079_s10 = smul.u32 (%p1359_p3), 24, %s1297_s15  ;;  %s1078_s11 = sshll.u32 (%p1359_p3), %s262_s9, 3 }
  0x1e   : > { %s264_s23 = scalar_lea.vmem (%p1359_p3), [#allocation4], %s1078_s11 }
  0x1f   : > { %s985_s22 = scalar_lea.vmem (%p1359_p3), %s1520_s2, %s1079_s10 }
  0x20   : > { %v1080_v4 = vld [vmem:[%s985_s22 + $0x8] sm:$0xf] (%p1359_p3)  ;;  %v1081_v5 = vld [vmem:[%s985_s22 + $0x14] sm:$0xf] (%p1359_p3) }
  0x21   : > { %285 = vst [vmem:[%s264_s23] sm:$0xf] (%p1359_p3), %v1080_v4  ;;  %287 = vst [vmem:[%s264_s23 + $0x4] sm:$0xf] (%p1359_p3), %v1081_v5 }
  0x23 PF: > { %p1082_p6 = scmp.ge.s32.totalorder %s1301_s16, 1  ;;  %p313_p7 = scmp.lt.s32.totalorder %s1301_s16, 3 }
  0x25   : > { %p314_p8 = pnand %p1082_p6, %p313_p7 }
  0x26   : > { %s320_s18 = sand.u32 (!%p314_p8), 1, %s1285_s12   ;;  %v1303_v6 = vmov (!%p314_p8), 0.0   ;;  %vm1304_vm0 = vmmov (!%p314_p8), 0   ;;  %vm397_vm1 = vcmask (!%p314_p8), 261120   ;;  %s1305_s26 = smov (!%p314_p8), 96   ;;  %vm445_vm2 = vcmask (!%p314_p8), 130048  }
  0x27   : > { %317 = sbr.rel (%p314_p8) target bundleno = 1205 (0x4b5), region = 143  ;;  %1134 = vmatprep.subr.bf16.mxu0 (!%p314_p8), %v1303_v6  ;;  %s1395_s24 = sshll.u32 (!%p314_p8), %s320_s18, 3  ;;  %1136 = vmatprep.mubr.msk.bf16.mxu0 (!%p314_p8), %vm1304_vm0, %v1303_v6  ;;  %vm527_vm3 = vcmask (!%p314_p8), 257024   ;;  %vm663_vm4 = vcmask (!%p314_p8), 519424   ;;  %vm799_vm5 = vcmask (!%p314_p8), 781824   ;;  %vm935_vm6 = vcmask (!%p314_p8), 1044224  }
  0x28   : > { %1140 = vmatprep.subr.bf16.mxu1 (!%p314_p8), %v1303_v6  ;;  %1142 = vmatprep.mubr.msk.bf16.mxu1 (!%p314_p8), %vm1304_vm0, %v1303_v6  ;;  %s329_s25 = scalar_lea.vmem (!%p314_p8), [#allocation3], %s1395_s24  ;;  %s322_s12 = scalar_lea.vmem (!%p314_p8), [#allocation2], %s1395_s24 }
  0x29   : > { %v1228_v7 = vld [vmem:[%s329_s25] sm:$0xff] (!%p314_p8)   ;;  %v1229_v9 = vld [vmem:[%s322_s12] sm:$0xff] (!%p314_p8)   ;;  %s1306_s27 = smov (!%p314_p8), 64   ;;  %s1307_s28 = smov (!%p314_p8), 32  }
  0x2a   : > { %v402_v8 = vsel (!%p314_p8), %vm397_vm1, %v1228_v7, 0  ;;  %532 = vrot.lane.b32.xlu1 (!%p314_p8), %v1228_v7, %s1305_s26  ;;  %s336_s29 = scalar_lea.vmem (!%p314_p8), [#allocation4], %s1395_s24  ;;  %p371_p9 = scmp.lt.s32.totalorder (!%p314_p8), %s1293_s14, 1 }
  0x2b   : > { %1135 = vmatpush3.bf16.xpose.msra.mxu0 (!%p314_p8), %v402_v8  ;;  %v1417_v16 = vld [vmem:[%s336_s29] sm:$0xff] (!%p314_p8)  }
  0x2c   : > { %1152 = vmatprep.subr.bf16.mxu0 (!%p314_p8), %v1303_v6  ;;  %1141 = vmatpush3.bf16.msra.mxu1 (!%p314_p8), %v1417_v16 }
  0x2d   : > { %1146 = vmatprep.subr.bf16.mxu1 (!%p314_p8), %v1303_v6 }
  0x2e   : > { %530 = vrot.lane.b32.xlu1 %v1229_v9, %s1305_s26  ;;  %s1530_s14 = smov (!%p371_p9, %s1293_s14), 1 }
  0x2f   : > { %s1109_s30 = sshll.u32 %s1530_s14, 3 }
  0x30   : > { %s1484_s6 = scalar_lea.vmem %s1521_s3, %s1109_s30 }
  0x32   : > { %1137 = vmatmul.mubr.msk.bf16.vlgmr.msra.gmra.mrb[0].mxu0 %vm397_vm1, %v1229_v9  ;;  %666 = vrot.lane.b32.xlu1 %v1229_v9, %s1306_s27 }
  0x33   : > { %1154 = vmatprep.mubr.msk.bf16.mxu0 %vm1304_vm0, %v1303_v6 }
  0x36   : > { %804 = vrot.lane.b32.xlu1 %v1228_v7, %s1307_s28 }
  0x3a   : > { %802 = vrot.lane.b32.xlu1 %v1229_v9, %s1307_s28 }
  0x9c   : > { %v533_v23 = vpop.permute.xlu1 %532 }
  0x9d   : > { %v538_v26 = vsel %vm397_vm1, %v533_v23, 0 }
  0xa0   : > { %v531_v28 = vpop.permute.xlu1 %530 }
  0xa4   : > { %v667_v30 = vpop.permute.xlu1 %666 }
  0xa8   : > { %v805_v32 = vpop.permute.xlu1 %804 }
  0xa9   : > { %v810_v33 = vsel %vm397_vm1, %v805_v32, 0 }
  0xac   : > { %v803_v34 = vpop.permute.xlu1 %802 }
 0x105   : > { %v438_v10 = vpop.f32.mrb[0].mxu0 }
 0x106   : > { %v1138_v11 = vpop.f32.mrb[1].mxu0  ;;  %v446_v12 = vsel %vm445_vm2, %v438_v10, -inf }
 0x107   : > { %447 = vmax.xlane.f32.xlu0 %v446_v12  ;;  %v441_v13 = vpop.f32.mrb[2].mxu0 }
 0x108   : > { %v1139_v14 = vpop.f32.mrb[3].mxu0  ;;  %v449_v15 = vsel %vm445_vm2, %v441_v13, -inf }
 0x10b   : > { %450 = vmax.xlane.f32.xlu0 %v449_v15 }
 0x121   : > { %668 = vrot.lane.b32.xlu0 %v1228_v7, %s1306_s27 }
 0x194   : > { %v448_v17 = vpop.xlane.xlu0 %447 }
 0x195   : > { %v452_v18 = vsub.f32 %v438_v10, %v448_v17 }
 0x197   : > { %v454_v19 = vmul.f32 1.442695, %v452_v18 }
 0x198   : > { %v451_v20 = vpop.xlane.xlu0 %450 }
 0x199   : > { %v453_v21 = vsub.f32 %v441_v13, %v451_v20  ;;  %1231 = vpow2.f32 %v454_v19 }
 0x19b   : > { %v456_v22 = vmul.f32 1.442695, %v453_v21 }
 0x19c   : > { %v669_v29 = vpop.permute.xlu0 %668 }
 0x19d   : > { %1233 = vpow2.f32 %v456_v22  ;;  %v674_v31 = vsel %vm397_vm1, %v669_v29, 0 }
 0x1a3   : > { %v1422_v24 = vpop.eup %1231 }
 0x1a4   : > { %v458_v23 = vsel %vm445_vm2, %v1422_v24, 0.0 }
 0x1a7   : > { %v1424_v25 = vpop.eup %1233 }
 0x1a8   : > { %v466_v27 = vpack.c.bf16 %v1424_v25, %v1422_v24 }
 0x1aa   : > { %1143 = vmatmul.mubr.msk.bf16.vlgmr.msra.gmra.mrb[0].mxu1 %vm445_vm2, %v466_v27 }
 0x1ab   : > { %1147 = vmatpush3.bf16.xpose.msra.mxu1 %v538_v26  ;;  %1148 = vmatprep.mubr.msk.bf16.mxu1 %vm1304_vm0, %v1303_v6 }
 0x1ac   : > { %1158 = vmatprep.subr.bf16.mxu1 %v1303_v6 }
 0x1b2   : > { %1149 = vmatmul.mubr.msk.bf16.vlgmr.msra.gmra.mrb[4].mxu1 %vm397_vm1, %v531_v28 }
 0x1b3   : > { %1159 = vmatpush3.bf16.xpose.msra.mxu1 %v674_v31  ;;  %1160 = vmatprep.mubr.msk.bf16.mxu1 %vm1304_vm0, %v1303_v6 }
 0x1b4   : > { %1170 = vmatprep.subr.bf16.mxu1 %v1303_v6 }
 0x1ba   : > { %1161 = vmatmul.mubr.msk.bf16.vlgmr.msra.gmra.mrb[8].mxu1 %vm397_vm1, %v667_v30 }
 0x1bb   : > { %1171 = vmatpush3.bf16.xpose.msra.mxu1 %v810_v33  ;;  %1172 = vmatprep.mubr.msk.bf16.mxu1 %vm1304_vm0, %v1303_v6 }
 0x1c2   : > { %1173 = vmatmul.mubr.msk.bf16.vlgmr.msra.gmra.mrb[12].mxu1 %vm397_vm1, %v803_v34 }
 0x27d   : > { %v1443_v35 = vpop.f32.mrb[0].mxu1 }
 0x27e   : > { %v1144_v36 = vpop.f32.mrb[1].mxu1 }
 0x27f   : > { %v1445_v37 = vpop.f32.mrb[2].mxu1 }
 0x280   : > { %v1145_v38 = vpop.f32.mrb[3].mxu1 }
 0x285   : > { %v574_v39 = vpop.f32.mrb[4].mxu1 }
 0x286   : > { %v1150_v40 = vpop.f32.mrb[5].mxu1  ;;  %v581_v41 = vsel %vm445_vm2, %v574_v39, -inf }
 0x287   : > { %582 = vmax.xlane.f32.xlu1 %v581_v41  ;;  %v577_v42 = vpop.f32.mrb[6].mxu1 }
 0x288   : > { %v1151_v43 = vpop.f32.mrb[7].mxu1  ;;  %v584_v44 = vsel %vm445_vm2, %v577_v42, -inf }
 0x289   : > { %585 = vmax.xlane.f32.xlu0 %v584_v44 }
 0x28d   : > { %v710_v45 = vpop.f32.mrb[8].mxu1 }
 0x28e   : > { %v1162_v46 = vpop.f32.mrb[9].mxu1  ;;  %v717_v47 = vsel %vm445_vm2, %v710_v45, -inf }
 0x28f   : > { %718 = vmax.xlane.f32.xlu1 %v717_v47  ;;  %v713_v48 = vpop.f32.mrb[10].mxu1 }
 0x290   : > { %v1163_v49 = vpop.f32.mrb[11].mxu1  ;;  %v720_v50 = vsel %vm445_vm2, %v713_v48, -inf }
 0x293   : > { %721 = vmax.xlane.f32.xlu1 %v720_v50 }
 0x295   : > { %v846_v51 = vpop.f32.mrb[12].mxu1 }
 0x296   : > { %v853_v52 = vsel %vm445_vm2, %v846_v51, -inf  ;;  %v1174_v53 = vpop.f32.mrb[13].mxu1 }
 0x297   : > { %854 = vmax.xlane.f32.xlu0 %v853_v52  ;;  %v849_v54 = vpop.f32.mrb[14].mxu1 }
 0x298   : > { %v1175_v55 = vpop.f32.mrb[15].mxu1  ;;  %v856_v56 = vsel %vm445_vm2, %v849_v54, -inf }
 0x2a4   : > { %738 = vrot.lane.b32.xlu1 %v1417_v16, %s1306_s27 }
 0x2ad   : > { %602 = vrot.lane.b32.xlu0 %v1417_v16, %s1305_s26 }
 0x2c8   : > { %857 = vmax.xlane.f32.xlu1 %v856_v56 }
 0x2d9   : > { %874 = vrot.lane.b32.xlu1 %v1417_v16, %s1307_s28 }
 0x314   : > { %v583_v57 = vpop.xlane.xlu1 %582 }
 0x315   : > { %v587_v58 = vsub.f32 %v574_v39, %v583_v57 }
 0x316   : > { %v586_v59 = vpop.xlane.xlu0 %585 }
 0x317   : > { %v589_v60 = vmul.f32 1.442695, %v587_v58  ;;  %v588_v61 = vsub.f32 %v577_v42, %v586_v59 }
 0x319   : > { %1235 = vpow2.f32 %v589_v60  ;;  %v591_v62 = vmul.f32 1.442695, %v588_v61 }
 0x31b   : > { %1237 = vpow2.f32 %v591_v62 }
 0x31c   : > { %v719_v63 = vpop.xlane.xlu1 %718 }
 0x31d   : > { %v723_v0 = vsub.f32 %v710_v45, %v719_v63 }
 0x31f   : > { %v725_v1 = vmul.f32 1.442695, %v723_v0 }
 0x320   : > { %v722_v2 = vpop.xlane.xlu1 %721 }
 0x321   : > { %1239 = vpow2.f32 %v725_v1  ;;  %v724_v3 = vsub.f32 %v713_v48, %v722_v2 }
 0x323   : > { %v1236_v4 = vpop.eup %1235  ;;  %v727_v5 = vmul.f32 1.442695, %v724_v3 }
 0x324   : > { %v855_v7 = vpop.xlane.xlu0 %854  ;;  %v593_v8 = vsel %vm445_vm2, %v1236_v4, 0.0  ;;  %v739_v16 = vpop.permute.xlu1 %738 }
 0x325   : > { %v1238_v9 = vpop.eup %1237  ;;  %1241 = vpow2.f32 %v727_v5  ;;  %v859_v10 = vsub.f32 %v846_v51, %v855_v7  ;;  %594 = vadd.xlane.f32.xlu0 %v593_v8 }
 0x326   : > { %v596_v11 = vsel %vm445_vm2, %v1238_v9, 0.0  ;;  %v601_v12 = vpack.c.bf16 %v1238_v9, %v1236_v4 }
 0x327   : > { %v861_v13 = vmul.f32 1.442695, %v859_v10  ;;  %597 = vadd.xlane.f32.xlu1 %v596_v11 }
 0x328   : > { %v603_v14 = vpop.permute.xlu0 %602 }
 0x329   : > { %1243 = vpow2.f32 %v861_v13  ;;  %1153 = vmatpush3.bf16.msra.mxu0 %v603_v14 }
 0x32a   : > { %1164 = vmatprep.subr.bf16.mxu0 %v1303_v6 }
 0x32b   : > { %v1240_v15 = vpop.eup %1239 }
 0x32c   : > { %1155 = vmatmul.mubr.msk.bf16.vlgmr.msra.gmra.mrb[4].mxu0 %vm445_vm2, %v601_v12  ;;  %v729_v17 = vsel %vm445_vm2, %v1240_v15, 0.0 }
 0x32d   : > { %730 = vadd.xlane.f32.xlu0 %v729_v17  ;;  %1165 = vmatpush3.bf16.msra.mxu0 %v739_v16 }
 0x32e   : > { %1166 = vmatprep.mubr.msk.bf16.mxu0 %vm1304_vm0, %v1303_v6  ;;  %1176 = vmatprep.subr.bf16.mxu0 %v1303_v6 }
 0x32f   : > { %v1242_v18 = vpop.eup %1241 }
 0x330   : > { %v732_v19 = vsel %vm445_vm2, %v1242_v18, 0.0  ;;  %v737_v20 = vpack.c.bf16 %v1242_v18, %v1240_v15 }
 0x331   : > { %733 = vadd.xlane.f32.xlu0 %v732_v19 }
 0x333   : > { %v1244_v21 = vpop.eup %1243 }
 0x334   : > { %1167 = vmatmul.mubr.msk.bf16.vlgmr.msra.gmra.mrb[8].mxu0 %vm445_vm2, %v737_v20  ;;  %v865_v22 = vsel %vm445_vm2, %v1244_v21, 0.0 }
 0x335   : > { %866 = vadd.xlane.f32.xlu1 %v865_v22  ;;  %1178 = vmatprep.mubr.msk.bf16.mxu0 %vm1304_vm0, %v1303_v6  ;;  %v461_v6 = vsel %vm445_vm2, %v1424_v25, 0.0 }
 0x339   : > { %459 = vadd.xlane.f32.xlu1 %v458_v23 }
 0x355   : > { %v858_v26 = vpop.xlane.xlu1 %857 }
 0x356   : > { %v860_v27 = vsub.f32 %v849_v54, %v858_v26 }
 0x358   : > { %v863_v28 = vmul.f32 1.442695, %v860_v27 }
 0x359   : > { %v875_v29 = vpop.permute.xlu1 %874 }
 0x35a   : > { %1245 = vpow2.f32 %v863_v28  ;;  %1177 = vmatpush3.bf16.msra.mxu0 %v875_v29 }
 0x364   : > { %v1246_v30 = vpop.eup %1245 }
 0x365   : > { %v868_v31 = vsel %vm445_vm2, %v1246_v30, 0.0  ;;  %v873_v32 = vpack.c.bf16 %v1246_v30, %v1244_v21 }
 0x366   : > { %869 = vadd.xlane.f32.xlu0 %v868_v31 }
 0x367   : > { %1179 = vmatmul.mubr.msk.bf16.vlgmr.msra.gmra.mrb[12].mxu0 %vm445_vm2, %v873_v32 }
 0x36a   : > { %462 = vadd.xlane.f32.xlu0 %v461_v6 }
 0x3b2   : > { %v595_v25 = vpop.xlane.xlu0 %594 }
 0x3b4   : > { %v598_v24 = vpop.xlane.xlu1 %597 }
 0x3ba   : > { %v731_v40 = vpop.xlane.xlu0 %730 }
 0x3be   : > { %v734_v41 = vpop.xlane.xlu0 %733 }
 0x3c2   : > { %v867_v33 = vpop.xlane.xlu1 %866 }
 0x3c6   : > { %v460_v34 = vpop.xlane.xlu1 %459 }
 0x3c7   : > { %1247 = vrcp.f32 %v460_v34 }
 0x3c8   : > { %1249 = vrcp.f32 %v595_v25 }
 0x3c9   : > { %1251 = vrcp.f32 %v598_v24 }
 0x3d1   : > { %v1248_v36 = vpop.eup %1247 }
 0x3d2   : > { %v517_v38 = vmul.f32 %v1248_v36, %v1443_v35  ;;  %v1250_v35 = vpop.eup %1249 }
 0x3d3   : > { %v1252_v47 = vpop.eup %1251 }
 0x3d4   : > { %v1110_v39 = vpack.c.bf16 %v517_v38, %v517_v38 }
 0x3d6   : > { %528 = vst.msk [vmem:[%s1484_s6] sm:$0xf] %vm527_vm3, %v1110_v39 }
 0x3f3   : > { %v870_v42 = vpop.xlane.xlu0 %869 }
 0x3f7   : > { %v463_v43 = vpop.xlane.xlu0 %462 }
 0x3f8   : > { %1253 = vrcp.f32 %v463_v43 }
 0x3f9   : > { %1255 = vrcp.f32 %v731_v40 }
 0x3fa   : > { %1257 = vrcp.f32 %v734_v41 }
 0x3fb   : > { %1259 = vrcp.f32 %v867_v33 }
 0x3fc   : > { %1261 = vrcp.f32 %v870_v42 }
 0x3ff   : > { %v642_v44 = vpop.f32.mrb[4].mxu0 }
 0x400   : > { %v649_v45 = vmul.f32 %v1250_v35, %v642_v44  ;;  %v1156_v46 = vpop.f32.mrb[5].mxu0 }
 0x401   : > { %v645_v48 = vpop.f32.mrb[6].mxu0 }
 0x402   : > { %v1254_v49 = vpop.eup %1253  ;;  %v1112_v50 = vpack.c.bf16 %v649_v45, %v649_v45  ;;  %v650_v51 = vmul.f32 %v1252_v47, %v645_v48  ;;  %v1157_v52 = vpop.f32.mrb[7].mxu0 }
 0x403   : > { %v518_v53 = vmul.f32 %v1254_v49, %v1445_v37  ;;  %v1256_v56 = vpop.eup %1255 }
 0x404   : > { %v1113_v54 = vpack.c.bf16 %v650_v51, %v650_v51  ;;  %657 = vrot.lane.b32.xlu1 %v1112_v50, %s1307_s28  ;;  %v1258_v60 = vpop.eup %1257 }
 0x405   : > { %v1111_v55 = vpack.c.bf16 %v518_v53, %v518_v53  ;;  %v1260_v1 = vpop.eup %1259 }
 0x406   : > { %659 = vrot.lane.b32.xlu0 %v1113_v54, %s1307_s28  ;;  %v1262_v5 = vpop.eup %1261 }
 0x407   : > { %v778_v57 = vpop.f32.mrb[8].mxu0  ;;  %529 = vst.msk [vmem:[%s1484_s6 + $0x4] sm:$0xf] %vm527_vm3, %v1111_v55 }
 0x408   : > { %v785_v58 = vmul.f32 %v1256_v56, %v778_v57  ;;  %v1168_v59 = vpop.f32.mrb[9].mxu0 }
 0x409   : > { %v781_v61 = vpop.f32.mrb[10].mxu0 }
 0x40a   : > { %v1114_v62 = vpack.c.bf16 %v785_v58, %v785_v58  ;;  %v786_v63 = vmul.f32 %v1258_v60, %v781_v61  ;;  %v1169_v0 = vpop.f32.mrb[11].mxu0 }
 0x40c   : > { %793 = vrot.lane.b32.xlu1 %v1114_v62, %s1306_s27  ;;  %v1115_v37 = vpack.c.bf16 %v786_v63, %v786_v63 }
 0x410   : > { %795 = vrot.lane.b32.xlu1 %v1115_v37, %s1306_s27 }
 0x43a   : > { %v914_v2 = vpop.f32.mrb[12].mxu0 }
 0x43b   : > { %v921_v3 = vmul.f32 %v1260_v1, %v914_v2  ;;  %v1180_v4 = vpop.f32.mrb[13].mxu0 }
 0x43c   : > { %v917_v7 = vpop.f32.mrb[14].mxu0 }
 0x43d   : > { %v1116_v8 = vpack.c.bf16 %v921_v3, %v921_v3  ;;  %v922_v9 = vmul.f32 %v1262_v5, %v917_v7  ;;  %v1181_v10 = vpop.f32.mrb[15].mxu0 }
 0x43f   : > { %v1117_v11 = vpack.c.bf16 %v922_v9, %v922_v9  ;;  %929 = vrot.lane.b32.xlu0 %v1116_v8, %s1305_s26 }
 0x441   : > { %931 = vrot.lane.b32.xlu1 %v1117_v11, %s1305_s26 }
 0x476   : > { %v658_v12 = vpop.permute.xlu1 %657 }
 0x477   : > { %664 = vst.msk [vmem:[%s1484_s6] sm:$0xf] %vm663_vm4, %v658_v12 }
 0x478   : > { %v660_v13 = vpop.permute.xlu0 %659 }
 0x479   : > { %665 = vst.msk [vmem:[%s1484_s6 + $0x4] sm:$0xf] %vm663_vm4, %v660_v13 }
 0x47e   : > { %v794_v14 = vpop.permute.xlu1 %793 }
 0x47f   : > { %800 = vst.msk [vmem:[%s1484_s6] sm:$0xf] %vm799_vm5, %v794_v14 }
 0x482   : > { %v796_v15 = vpop.permute.xlu1 %795 }
 0x483   : > { %801 = vst.msk [vmem:[%s1484_s6 + $0x4] sm:$0xf] %vm799_vm5, %v796_v15 }
 0x4b1   : > { %v930_v16 = vpop.permute.xlu0 %929 }
 0x4b2   : > { %936 = vst.msk [vmem:[%s1484_s6] sm:$0xf] %vm935_vm6, %v930_v16 }
 0x4b3   : > { %v932_v17 = vpop.permute.xlu1 %931 }
 0x4b4   : > { %937 = vst.msk [vmem:[%s1484_s6 + $0x4] sm:$0xf] %vm935_vm6, %v932_v17 }
 0x4b5 PF: > { %s13_s16 = sadd.s32 1, %s1301_s16   ;;  %s1523_s12 = smov %s1289_s13 }
 0x4b6   : > { %p10_p10 = scmp.ge.s32.totalorder %s13_s16, 4   ;;  %s1524_s13 = smov %s1367_s21 }
 0x4b7   : > { %s1525_s14 = smov %s1297_s15  ;;  %s1526_s15 = smov %s1528_s17 }
 0x4b8   :  { %12 = sbr.rel (!%p10_p10) target bundleno = 3 (0x3), region = 206 }

</bundles_post_ra>
